<compile_context>
chip_gen: v6e
topology: v6e:2x2x1
jax: 0.10.0
libtpu: 0.0.40
codegen_flags: <defaults>
</compile_context>

<pallas_src>
import functools

import jax
import jax.numpy as jnp
from jax.experimental import pallas as pl
from jax.experimental.pallas import tpu as pltpu


# ----------------------------------------------------------------------------
# Kernel: per-(image, channel-block) GeM pooling, reduction tiled over H*W
# ----------------------------------------------------------------------------
def _gem_kernel(x_ref, p_ref, o_ref, acc_ref, *, eps, inv_hw, hw, thw, needs_mask):
    # x_ref:   (1, Cblk, THW)  channels on sublanes, spatial tile on lanes
    # p_ref:   (Cblk, 1)       per-channel exponent, broadcast along lanes
    # o_ref:   (1, Cblk, 1)    pooled output column for this (image, c-block)
    # acc_ref: (Cblk, 1) f32   running sum of clamp(x, eps) ** p over H*W
    t = pl.program_id(2)

    @pl.when(t == 0)
    def _():
        acc_ref[...] = jnp.zeros_like(acc_ref)

    x = x_ref[0].astype(jnp.float32)                 # (Cblk, THW)
    p = p_ref[...]                                   # (Cblk, 1)
    # clamp(min=eps) ** p  ==  exp(p * log(max(x, eps)))  (base > 0 after clamp)
    y = jnp.exp(p * jnp.log(jnp.maximum(x, eps)))    # EUP exp/log, VPU mul

    if needs_mask:
        # Tail tile of a cdiv grid: zero the padded lanes so they don't
        # contribute to the spatial sum.
        lane = jax.lax.broadcasted_iota(jnp.int32, y.shape, dimension=1)
        y = jnp.where(lane < (hw - t * thw), y, 0.0)

    acc_ref[...] += jnp.sum(y, axis=-1, keepdims=True)   # lane reduce -> XLU

    @pl.when(t == pl.num_programs(2) - 1)
    def _():
        mean = acc_ref[...] * inv_hw                 # global average pool
        o_ref[0] = jnp.exp(jnp.log(mean) / p)        # ** (1 / p), (Cblk, 1)


# ----------------------------------------------------------------------------
# Tiling helpers
# ----------------------------------------------------------------------------
def _pick_c_block(c, max_cblk=256):
    """Channel block: multiple of 8 (sublane) dividing C, preferring >= 2
    blocks so the channel grid axis can shard across TensorCores (v7x) even at
    batch size 1.  Falls back to the full channel extent (always legal)."""
    if c % 8 != 0:
        return c
    cap = min(max_cblk, c // 2) if c >= 16 else c
    cap = max(8, (cap // 8) * 8)
    for cand in range(cap, 7, -8):
        if c % cand == 0:
            return cand
    return c


def _pick_hw_tile(hw, cblk, itemsize, budget_bytes):
    """Spatial (lane) tile: largest multiple of 128 whose double-buffered
    (Cblk, THW) input block fits the budget; whole extent if it already fits.
    Non-divisible H*W is handled by a cdiv grid + in-kernel tail mask."""
    max_lanes = budget_bytes // (2 * itemsize * cblk)
    max_lanes = max(128, (max_lanes // 128) * 128)
    if hw <= max_lanes:
        return hw            # full extent is always a legal block dim
    return max_lanes


# ----------------------------------------------------------------------------
# Wrapper: NCHW input, per-channel p, eps  ->  (N, C) pooled descriptors
# ----------------------------------------------------------------------------
def gem_forward(x_nchw, p, eps=1e-6, *, spatial_budget_bytes=8 << 20):
    n, c, h, w = x_nchw.shape
    hw = h * w
    itemsize = jnp.dtype(x_nchw.dtype).itemsize

    # Free reshape (NCHW is contiguous): no transpose, no extra HBM pass.
    x_chw = x_nchw.reshape(n, c, hw)
    p2 = p.reshape(c, 1).astype(jnp.float32)

    cblk = _pick_c_block(c)
    thw = _pick_hw_tile(hw, cblk, itemsize, spatial_budget_bytes)
    grid_t = pl.cdiv(hw, thw)
    needs_mask = (hw % thw) != 0
    grid = (n, c // cblk, grid_t)

    # VMEM accounting from the blocks actually chosen (x double-buffered; p,
    # out and the accumulator are tiny), with ~1.5x headroom.
    x_block = cblk * thw * itemsize
    total = 2 * x_block + 2 * cblk * 4 + 2 * cblk * 4 + cblk * 4
    vmem_limit = int(min(max(1.5 * total, 4 << 20), 64 << 20))

    kernel = functools.partial(
        _gem_kernel,
        eps=float(eps),
        inv_hw=1.0 / float(hw),
        hw=hw,
        thw=thw,
        needs_mask=needs_mask,
    )

    out = pl.pallas_call(
        kernel,
        out_shape=jax.ShapeDtypeStruct((n, c, 1), jnp.float32),
        grid_spec=pltpu.PrefetchScalarGridSpec(
            num_scalar_prefetch=0,
            grid=grid,
            in_specs=[
                pl.BlockSpec((1, cblk, thw), lambda i, cb, t: (i, cb, t)),
                pl.BlockSpec((cblk, 1), lambda i, cb, t: (cb, 0)),
            ],
            out_specs=pl.BlockSpec((1, cblk, 1), lambda i, cb, t: (i, cb, 0)),
            scratch_shapes=[pltpu.VMEM((cblk, 1), jnp.float32)],
        ),
        compiler_params=pltpu.CompilerParams(
            dimension_semantics=("parallel", "parallel", "arbitrary"),
            vmem_limit_bytes=vmem_limit,
        ),
    )(x_chw, p2)

    return out.reshape(n, c)     # free reshape of the tiny (N, C, 1) result


# ----------------------------------------------------------------------------
# Pure-JAX reference (mirrors the PyTorch GeM.gem math exactly)
# ----------------------------------------------------------------------------
def gem_ref(x_nchw, p, eps=1e-6):
    xc = jnp.maximum(x_nchw.astype(jnp.float32), eps)   # clamp(min=eps)
    y = xc ** p[None, :, None, None]                    # per-channel pow
    m = jnp.mean(y, axis=(2, 3))                        # global avg pool
    return m ** (1.0 / p)[None, :]                      # pow(1/p)


if __name__ == "__main__":
    key = jax.random.PRNGKey(0)
    kx, kp = jax.random.split(key)

    # Small shapes consistent with the module (default dim=2048; use a smaller
    # channel count so the test is fast but still exercises channel blocking).
    N, C, H, W = 2, 256, 16, 16
    x = jax.random.normal(kx, (N, C, H, W), jnp.float32)
    # GeM init is ones(dim) * 3; perturb slightly so the per-channel exponent
    # broadcast path is actually exercised.
    p = 3.0 + 0.2 * jax.random.uniform(kp, (C,), jnp.float32)
    eps = 1e-6

    fwd = jax.jit(functools.partial(gem_forward, eps=eps))
    out = jax.block_until_ready(fwd(x, p))
    ref = gem_ref(x, p, eps)
    assert out.shape == (N, C)
    assert bool(jnp.all(jnp.isfinite(out)))
    assert bool(jnp.allclose(out, ref, rtol=2e-3, atol=1e-5)), (
        float(jnp.max(jnp.abs(out - ref))))

    # Second config: awkward H*W plus a tiny spatial budget forces the
    # cdiv grid + masked tail-tile path.
    H2, W2 = 9, 23
    x2 = jax.random.normal(kx, (N, C, H2, W2), jnp.float32)
    fwd2 = jax.jit(functools.partial(gem_forward, eps=eps,
                                     spatial_budget_bytes=128 * 1024))
    out2 = jax.block_until_ready(fwd2(x2, p))
    ref2 = gem_ref(x2, p, eps)
    assert out2.shape == (N, C)
    assert bool(jnp.all(jnp.isfinite(out2)))
    assert bool(jnp.allclose(out2, ref2, rtol=2e-3, atol=1e-5)), (
        float(jnp.max(jnp.abs(out2 - ref2))))

    print("KERNEL_OK")
</pallas_src>

<mosaic_0001>
module attributes {stable_mosaic.version = 11 : i64} {
  func.func @_gem_kernel(%arg0: i32, %arg1: i32, %arg2: i32, %arg3: memref<1x128x256xf32, #tpu.memory_space<vmem>>, %arg4: memref<128x1xf32, #tpu.memory_space<vmem>>, %arg5: memref<1x128x1xf32, #tpu.memory_space<vmem>>, %arg6: memref<128x1xf32, #tpu.memory_space<vmem>>) attributes {dimension_semantics = [#tpu.dimension_semantics<parallel>, #tpu.dimension_semantics<parallel>, #tpu.dimension_semantics<arbitrary>], iteration_bounds = array<i64: 2, 2, 1>, scalar_prefetch = 0 : i64, scratch_operands = 1 : i64, tpu.core_type = #tpu.core_type<tc>, window_params = [{transform_indices = @transform_0, window_bounds = array<i64: 1, 128, 256>}, {transform_indices = @transform_1, window_bounds = array<i64: 128, 1>}, {transform_indices = @transform_2, window_bounds = array<i64: 1, 128, 1>}]} {
    %c0_i32 = arith.constant 0 : i32
    %0 = arith.cmpi eq, %arg2, %c0_i32 : i32
    %1 = arith.extui %0 : i1 to i32
    %c0_i32_0 = arith.constant 0 : i32
    %2 = arith.cmpi ne, %1, %c0_i32_0 : i32
    scf.if %2 {
      %cst_12 = arith.constant 0.000000e+00 : f32
      %20 = vector.broadcast %cst_12 : f32 to vector<128x1xf32>
      %c0_13 = arith.constant 0 : index
      %c0_14 = arith.constant 0 : index
      %21 = vector.load %arg6[%c0_13, %c0_14] : memref<128x1xf32, #tpu.memory_space<vmem>>, vector<128x1xf32>
      tpu.vector_store %arg6[%c0_13, %c0_14], %20 {strides = array<i32>} : memref<128x1xf32, #tpu.memory_space<vmem>>, vector<128x1xf32>,
    } else {
    }
    %c0 = arith.constant 0 : index
    %c0_1 = arith.constant 0 : index
    %c0_2 = arith.constant 0 : index
    %3 = vector.load %arg3[%c0, %c0_1, %c0_2] : memref<1x128x256xf32, #tpu.memory_space<vmem>>, vector<1x128x256xf32>
    %4 = vector.shape_cast %3 : vector<1x128x256xf32> to vector<128x256xf32>
    %c0_3 = arith.constant 0 : index
    %c0_4 = arith.constant 0 : index
    %5 = vector.load %arg4[%c0_3, %c0_4] : memref<128x1xf32, #tpu.memory_space<vmem>>, vector<128x1xf32>
    %cst = arith.constant 9.99999997E-7 : f32
    %6 = vector.broadcast %cst : f32 to vector<128x256xf32>
    %7 = arith.maximumf %4, %6 : vector<128x256xf32>
    %8 = math.log %7 : vector<128x256xf32>
    %9 = vector.broadcast %5 : vector<128x1xf32> to vector<128x256xf32>
    %10 = arith.mulf %9, %8 : vector<128x256xf32>
    %11 = math.exp %10 : vector<128x256xf32>
    %c0_5 = arith.constant 0 : index
    %c0_6 = arith.constant 0 : index
    %12 = vector.load %arg6[%c0_5, %c0_6] : memref<128x1xf32, #tpu.memory_space<vmem>>, vector<128x1xf32>
    %cst_7 = arith.constant dense<0.000000e+00> : vector<128xf32>
    %13 = vector.multi_reduction <add>, %11, %cst_7 [1] : vector<128x256xf32> to vector<128xf32>
    %14 = vector.shape_cast %13 : vector<128xf32> to vector<128x1xf32>
    %15 = arith.addf %12, %14 : vector<128x1xf32>
    %c0_8 = arith.constant 0 : index
    %c0_9 = arith.constant 0 : index
    %16 = vector.load %arg6[%c0_8, %c0_9] : memref<128x1xf32, #tpu.memory_space<vmem>>, vector<128x1xf32>
    tpu.vector_store %arg6[%c0_8, %c0_9], %15 {strides = array<i32>} : memref<128x1xf32, #tpu.memory_space<vmem>>, vector<128x1xf32>,
    %c0_i32_10 = arith.constant 0 : i32
    %17 = arith.cmpi eq, %arg2, %c0_i32_10 : i32
    %18 = arith.extui %17 : i1 to i32
    %c0_i32_11 = arith.constant 0 : i32
    %19 = arith.cmpi ne, %18, %c0_i32_11 : i32
    scf.if %19 {
      %c0_12 = arith.constant 0 : index
      %c0_13 = arith.constant 0 : index
      %20 = vector.load %arg6[%c0_12, %c0_13] : memref<128x1xf32, #tpu.memory_space<vmem>>, vector<128x1xf32>
      %cst_14 = arith.constant 3.906250e-03 : f32
      %21 = vector.broadcast %cst_14 : f32 to vector<128x1xf32>
      %22 = arith.mulf %20, %21 : vector<128x1xf32>
      %23 = math.log %22 : vector<128x1xf32>
      %24 = arith.divf %23, %5 : vector<128x1xf32>
      %25 = math.exp %24 : vector<128x1xf32>
      %c0_15 = arith.constant 0 : index
      %c0_16 = arith.constant 0 : index
      %c0_17 = arith.constant 0 : index
      %26 = vector.load %arg5[%c0_15, %c0_16, %c0_17] : memref<1x128x1xf32, #tpu.memory_space<vmem>>, vector<1x128x1xf32>
      %27 = vector.shape_cast %26 : vector<1x128x1xf32> to vector<128x1xf32>
      %28 = vector.shape_cast %25 : vector<128x1xf32> to vector<1x128x1xf32>
      tpu.vector_store %arg5[%c0_15, %c0_16, %c0_17], %28 {strides = array<i32>} : memref<1x128x1xf32, #tpu.memory_space<vmem>>, vector<1x128x1xf32>,
    } else {
    }
    return
  }
  func.func @transform_0(%arg0: i32, %arg1: i32, %arg2: i32) -> (i32, i32, i32) {
    %c0_i32 = arith.constant 0 : i32
    return %arg0, %arg1, %arg2 : i32, i32, i32
  }
  func.func @transform_1(%arg0: i32, %arg1: i32, %arg2: i32) -> (i32, i32) {
    %c0_i32 = arith.constant 0 : i32
    %c0_i32_0 = arith.constant 0 : i32
    return %arg1, %c0_i32 : i32, i32
  }
  func.func @transform_2(%arg0: i32, %arg1: i32, %arg2: i32) -> (i32, i32, i32) {
    %c0_i32 = arith.constant 0 : i32
    %c0_i32_0 = arith.constant 0 : i32
    return %arg0, %arg1, %c0_i32 : i32, i32, i32
  }
}

</mosaic_0001>

<bundles_post_ra>
// kernel: gem_forward.1
= control target key start
LH: loop header
LB: loop body
LE: loop exit
PB: predicated region body
PF: predicated region fallthrough
CT: control target
= control target key end

     0   :  { %s1268_s9 = smov 0   ;;  %s1270_s10 = smov 0   ;;  %s1519_s0 = inlined_call_operand.vmem [shape: f32[2,256,256], index: 0, kind: input, shape index: {}]   ;;  %s1520_s1 = inlined_call_operand.vmem [shape: f32[256,1], index: 1, kind: input, shape index: {}]   ;;  %s1521_s2 = inlined_call_operand.vmem [shape: f32[2,256,1], index: 2, kind: output, shape index: {}]  }
   0x1   :  { %s1272_s11 = smov 0   ;;  %s1274_s12 = smov 0  }
   0x2   :  { %s1276_s13 = smov 0  }
   0x3 LB: > { %s27_s14 = sadd.s32 1, %s1241_s11  ;;  %s31_s15 = sadd.s32 1, %s1245_s12  ;;  %s1249_s13 = sphi %s1276_s13, %s12_s13   ;;  %s1245_s12 = sphi %s1274_s12, %s1525_s12   ;;  %s1241_s11 = sphi %s1272_s11, %s1524_s11   ;;  %s1237_s10 = sphi %s1270_s10, %s1523_s10   ;;  %s1233_s9 = sphi %s1268_s9, %s1522_s9  }
   0x4   : > { %p29_p0 = scmp.ge.s32.totalorder %s27_s14, 2  ;;  %p931_p1 = scmp.ge.s32.totalorder %s1249_s13, 1 }
   0x5   : > { %p159_p2 = scmp.lt.s32.totalorder %s1249_s13, 5 }
   0x6   : > { %s1527_s14 = smov (%p29_p0, %s27_s14), 0  ;;  %s1529_s15 = smov (!%p29_p0, %s31_s15), %s1245_s12 }
   0x7   : > { %p160_p3 = pnand %p931_p1, %p159_p2  ;;  %p33_p4 = scmp.ge.s32.totalorder %s1529_s15, 2 }
   0x8   : > { %s932_s16 = sshll.u32 (!%p160_p3), %s1233_s9, 4  ;;  %p201_p5 = scmp.lt.s32.totalorder (!%p160_p3), %s1237_s10, 1 }
   0x9   : > { %s1531_s15 = smov (%p33_p4, %s1529_s15), 0  ;;  %163 = sbr.rel (%p160_p3) target bundleno = 384 (0x180), region = 28 }
   0xa   : > { %p203_p6 = scmp.lt.s32.totalorder (!%p160_p3), %s932_s16, 31 }
   0xe   : > { %v1251_v0 = vmov 0   ;;  %s1533_s10 = smov (!%p201_p5, %s1237_s10), 1  ;;  %s1535_s16 = smov (!%p203_p6, %s932_s16), 31  ;;  %vm235_vm0 = vcmask 7168   ;;  %v1252_v17 = vmov 0.0  }
   0xf   : > { %986 = vset.pattern.permute.xlu1 %v1251_v0  ;;  %985 = vset.pattern.permute.xlu0 %v1251_v0  ;;  %s939_s17 = sshll.u32 %s1533_s10, 5  ;;  %s937_s18 = sshll.u32 %s1535_s16, 3  ;;  %236 = vst.msk [vmem:[#allocation2] sm:$0xff] %vm235_vm0, %v1252_v17  ;;  %237 = vst.msk [vmem:[#allocation2 + $0x8] sm:$0xff] %vm235_vm0, %v1252_v17 }
  0x10   : > { %s1305_s19 = sadd.s32 %s939_s17, %s1535_s16  ;;  %s219_s22 = scalar_lea.vmem %s1520_s1, %s937_s18  ;;  %238 = vst.msk [vmem:[#allocation2 + $0x10] sm:$0xff] %vm235_vm0, %v1252_v17  ;;  %239 = vst.msk [vmem:[#allocation2 + $0x18] sm:$0xff] %vm235_vm0, %v1252_v17 }
  0x11   : > { %v1310_v1 = vld [vmem:[%s219_s22 + $0x10] sm:$0xff]  ;;  %v1312_v2 = vld [vmem:[%s219_s22] sm:$0xff]  ;;  %v1316_v3 = vld [vmem:[%s219_s22 + $0x18] sm:$0xff]  ;;  %240 = vst.msk [vmem:[#allocation2 + $0x20] sm:$0xff] %vm235_vm0, %v1252_v17  ;;  %s934_s23 = sshll.u32 %s1533_s10, 6  ;;  %s933_s24 = sshll.u32 %s1535_s16, 1 }
  0x12   : > { %408 = vperm.xlu1 %986, %v1310_v1   ;;  %398 = vperm.xlu0 %985, %v1312_v2   ;;  %v1318_v4 = vld [vmem:[%s219_s22 + $0x8] sm:$0xff]  ;;  %v1324_v6 = vld [vmem:[%s219_s22 + $0x20] sm:$0xff]  ;;  %v1328_v7 = vld [vmem:[%s219_s22 + $0x38] sm:$0xff]  ;;  %241 = vst.msk [vmem:[#allocation2 + $0x28] sm:$0xff] %vm235_vm0, %v1252_v17  ;;  %s210_s25 = sadd.s32 %s934_s23, %s933_s24  ;;  %s940_s30 = sshll.u32 %s1305_s19, 3 }
  0x13   : > { %v1322_v5 = vld [vmem:[%s219_s22 + $0x28] sm:$0xff]  ;;  %v1330_v8 = vld [vmem:[%s219_s22 + $0x30] sm:$0xff]  ;;  %v1336_v10 = vld [vmem:[%s219_s22 + $0x40] sm:$0xff]  ;;  %242 = vst.msk [vmem:[#allocation2 + $0x30] sm:$0xff] %vm235_vm0, %v1252_v17  ;;  %s935_s26 = sshll.u32 %s210_s25, 3  ;;  %s1466_s5 = scalar_lea.vmem %s1521_s2, %s940_s30 }
  0x14   : > { %v1334_v9 = vld [vmem:[%s219_s22 + $0x48] sm:$0xff]  ;;  %v1340_v11 = vld [vmem:[%s219_s22 + $0x58] sm:$0xff]  ;;  %v1342_v12 = vld [vmem:[%s219_s22 + $0x50] sm:$0xff]  ;;  %243 = vst.msk [vmem:[#allocation2 + $0x38] sm:$0xff] %vm235_vm0, %v1252_v17  ;;  %s1379_s29 = scalar_lea.vmem %s1519_s0, %s935_s26 }
  0x15   : > { %v1346_v13 = vld [vmem:[%s219_s22 + $0x68] sm:$0xff]  ;;  %v1348_v14 = vld [vmem:[%s219_s22 + $0x60] sm:$0xff]  ;;  %v1352_v15 = vld [vmem:[%s219_s22 + $0x78] sm:$0xff]  ;;  %244 = vst.msk [vmem:[#allocation2 + $0x40] sm:$0xff] %vm235_vm0, %v1252_v17 }
  0x16   : > { %413 = vperm.xlu1 %986, %v1316_v3   ;;  %403 = vperm.xlu0 %985, %v1318_v4   ;;  %v1354_v16 = vld [vmem:[%s219_s22 + $0x70] sm:$0xff]  ;;  %245 = vst.msk [vmem:[#allocation2 + $0x48] sm:$0xff] %vm235_vm0, %v1252_v17  ;;  %246 = vst.msk [vmem:[#allocation2 + $0x50] sm:$0xff] %vm235_vm0, %v1252_v17  ;;  %v256_v18 = vld [vmem:[%s1379_s29 + $0x20] sm:$0xff] }
  0x17   : > { %247 = vst.msk [vmem:[#allocation2 + $0x58] sm:$0xff] %vm235_vm0, %v1252_v17  ;;  %248 = vst.msk [vmem:[#allocation2 + $0x60] sm:$0xff] %vm235_vm0, %v1252_v17  ;;  %v257_v19 = vld [vmem:[%s1379_s29 + $0x28] sm:$0xff]  ;;  %v252_v20 = vld [vmem:[%s1379_s29] sm:$0xff]  ;;  %v304_v21 = vmax.f32 %v256_v18, 1e-06 }
  0x18   : > { %249 = vst.msk [vmem:[#allocation2 + $0x68] sm:$0xff] %vm235_vm0, %v1252_v17  ;;  %250 = vst.msk [vmem:[#allocation2 + $0x70] sm:$0xff] %vm235_vm0, %v1252_v17  ;;  %v253_v22 = vld [vmem:[%s1379_s29 + $0x8] sm:$0xff]  ;;  %v305_v23 = vmax.f32 %v257_v19, 1e-06  ;;  %v258_v24 = vld [vmem:[%s1379_s29 + $0x30] sm:$0xff] }
  0x19   : > { %251 = vst.msk [vmem:[#allocation2 + $0x78] sm:$0xff] %vm235_vm0, %v1252_v17  ;;  %v300_v25 = vmax.f32 %v252_v20, 1e-06  ;;  %v259_v26 = vld [vmem:[%s1379_s29 + $0x38] sm:$0xff]  ;;  %v301_v27 = vmax.f32 %v253_v22, 1e-06  ;;  %987 = vlog2.f32 %v304_v21 }
  0x1a   : > { %423 = vperm.xlu1 %986, %v1322_v5   ;;  %418 = vperm.xlu0 %985, %v1324_v6   ;;  %v254_v28 = vld [vmem:[%s1379_s29 + $0x10] sm:$0xff]  ;;  %v306_v29 = vmax.f32 %v258_v24, 1e-06  ;;  %v255_v30 = vld [vmem:[%s1379_s29 + $0x18] sm:$0xff]  ;;  %989 = vlog2.f32 %v305_v23  ;;  %v307_v31 = vmax.f32 %v259_v26, 1e-06 }
  0x1b   : > { %v262_v32 = vld [vmem:[%s1379_s29 + $0x50] sm:$0xff]  ;;  %991 = vlog2.f32 %v300_v25  ;;  %v302_v33 = vmax.f32 %v254_v28, 1e-06  ;;  %v263_v34 = vld [vmem:[%s1379_s29 + $0x58] sm:$0xff]  ;;  %v303_v35 = vmax.f32 %v255_v30, 1e-06 }
  0x1c   : > { %993 = vlog2.f32 %v301_v27  ;;  %v260_v36 = vld [vmem:[%s1379_s29 + $0x40] sm:$0xff]  ;;  %v310_v37 = vmax.f32 %v262_v32, 1e-06  ;;  %v261_v38 = vld [vmem:[%s1379_s29 + $0x48] sm:$0xff]  ;;  %v311_v39 = vmax.f32 %v263_v34, 1e-06 }
  0x1d   : > { %995 = vlog2.f32 %v306_v29  ;;  %v266_v40 = vld [vmem:[%s1379_s29 + $0x70] sm:$0xff]  ;;  %v308_v41 = vmax.f32 %v260_v36, 1e-06  ;;  %v267_v42 = vld [vmem:[%s1379_s29 + $0x78] sm:$0xff]  ;;  %v309_v43 = vmax.f32 %v261_v38, 1e-06 }
  0x1e   : > { %433 = vperm.xlu1 %986, %v1328_v7   ;;  %428 = vperm.xlu0 %985, %v1330_v8   ;;  %997 = vlog2.f32 %v307_v31  ;;  %v264_v44 = vld [vmem:[%s1379_s29 + $0x60] sm:$0xff]  ;;  %v314_v45 = vmax.f32 %v266_v40, 1e-06  ;;  %v265_v46 = vld [vmem:[%s1379_s29 + $0x68] sm:$0xff]  ;;  %v315_v47 = vmax.f32 %v267_v42, 1e-06 }
  0x1f   : > { %999 = vlog2.f32 %v302_v33  ;;  %v270_v48 = vld [vmem:[%s1379_s29 + $0x90] sm:$0xff]  ;;  %v312_v49 = vmax.f32 %v264_v44, 1e-06  ;;  %v271_v50 = vld [vmem:[%s1379_s29 + $0x98] sm:$0xff]  ;;  %v313_v51 = vmax.f32 %v265_v46, 1e-06 }
  0x20   : > { %1001 = vlog2.f32 %v303_v35  ;;  %v268_v52 = vld [vmem:[%s1379_s29 + $0x80] sm:$0xff]  ;;  %v318_v53 = vmax.f32 %v270_v48, 1e-06  ;;  %v269_v54 = vld [vmem:[%s1379_s29 + $0x88] sm:$0xff]  ;;  %v319_v56 = vmax.f32 %v271_v50, 1e-06 }
  0x21   : > { %1003 = vlog2.f32 %v310_v37  ;;  %v274_v57 = vld [vmem:[%s1379_s29 + $0xb0] sm:$0xff]  ;;  %v316_v59 = vmax.f32 %v268_v52, 1e-06  ;;  %v275_v60 = vld [vmem:[%s1379_s29 + $0xb8] sm:$0xff]  ;;  %v317_v62 = vmax.f32 %v269_v54, 1e-06 }
  0x22   : > { %443 = vperm.xlu1 %986, %v1334_v9   ;;  %438 = vperm.xlu0 %985, %v1336_v10   ;;  %1005 = vlog2.f32 %v311_v39  ;;  %v272_v63 = vld [vmem:[%s1379_s29 + $0xa0] sm:$0xff]  ;;  %v322_v17 = vmax.f32 %v274_v57, 1e-06  ;;  %v273_v18 = vld [vmem:[%s1379_s29 + $0xa8] sm:$0xff]  ;;  %v323_v20 = vmax.f32 %v275_v60, 1e-06 }
  0x23   : > { %1007 = vlog2.f32 %v308_v41  ;;  %v278_v21 = vld [vmem:[%s1379_s29 + $0xd0] sm:$0xff]  ;;  %v320_v23 = vmax.f32 %v272_v63, 1e-06  ;;  %v279_v24 = vld [vmem:[%s1379_s29 + $0xd8] sm:$0xff]  ;;  %v321_v26 = vmax.f32 %v273_v18, 1e-06 }
  0x24   : > { %1009 = vlog2.f32 %v309_v43  ;;  %v276_v27 = vld [vmem:[%s1379_s29 + $0xc0] sm:$0xff]  ;;  %v326_v29 = vmax.f32 %v278_v21, 1e-06  ;;  %v277_v30 = vld [vmem:[%s1379_s29 + $0xc8] sm:$0xff]  ;;  %v327_v32 = vmax.f32 %v279_v24, 1e-06 }
  0x25   : > { %1011 = vlog2.f32 %v314_v45  ;;  %v282_v33 = vld [vmem:[%s1379_s29 + $0xf0] sm:$0xff]  ;;  %v324_v35 = vmax.f32 %v276_v27, 1e-06  ;;  %v325_v37 = vmax.f32 %v277_v30, 1e-06  ;;  %v283_v38 = vld [vmem:[%s1379_s29 + $0xf8] sm:$0xff] }
  0x26   : > { %453 = vperm.xlu1 %986, %v1340_v11   ;;  %448 = vperm.xlu0 %985, %v1342_v12   ;;  %v988_v55 = vpop.eup %987  ;;  %1013 = vlog2.f32 %v315_v47  ;;  %v330_v41 = vmax.f32 %v282_v33, 1e-06  ;;  %v280_v42 = vld [vmem:[%s1379_s29 + $0xe0] sm:$0xff]  ;;  %v281_v43 = vld [vmem:[%s1379_s29 + $0xe8] sm:$0xff] }
  0x27   : > { %v990_v58 = vpop.eup %989  ;;  %1015 = vlog2.f32 %v312_v49  ;;  %v341_v40 = vmul.f32 0.6931472, %v988_v55  ;;  %v331_v49 = vmax.f32 %v283_v38, 1e-06  ;;  %v329_v52 = vmax.f32 %v281_v43, 1e-06 }
  0x28   : > { %v992_v61 = vpop.eup %991  ;;  %1017 = vlog2.f32 %v313_v51  ;;  %v343_v45 = vmul.f32 0.6931472, %v990_v58  ;;  %v328_v51 = vmax.f32 %v280_v42, 1e-06 }
  0x29   : > { %v994_v0 = vpop.eup %993  ;;  %1019 = vlog2.f32 %v318_v53  ;;  %v333_v46 = vmul.f32 0.6931472, %v992_v61 }
  0x2a   : > { %463 = vperm.xlu1 %986, %v1346_v13   ;;  %458 = vperm.xlu0 %985, %v1348_v14   ;;  %v996_v19 = vpop.eup %995  ;;  %1021 = vlog2.f32 %v319_v56  ;;  %v335_v47 = vmul.f32 0.6931472, %v994_v0 }
  0x2b   : > { %v998_v22 = vpop.eup %997  ;;  %1023 = vlog2.f32 %v316_v59  ;;  %v345_v55 = vmul.f32 0.6931472, %v996_v19 }
  0x2c   : > { %v1000_v25 = vpop.eup %999  ;;  %1025 = vlog2.f32 %v317_v62  ;;  %v347_v57 = vmul.f32 0.6931472, %v998_v22 }
  0x2d   : > { %v1002_v28 = vpop.eup %1001  ;;  %1027 = vlog2.f32 %v322_v17  ;;  %v337_v59 = vmul.f32 0.6931472, %v1000_v25 }
  0x2e   : > { %473 = vperm.xlu1 %986, %v1352_v15   ;;  %468 = vperm.xlu0 %985, %v1354_v16   ;;  %v1004_v31 = vpop.eup %1003  ;;  %1029 = vlog2.f32 %v323_v20  ;;  %v339_v17 = vmul.f32 0.6931472, %v1002_v28 }
  0x2f   : > { %v1006_v34 = vpop.eup %1005  ;;  %1031 = vlog2.f32 %v320_v23  ;;  %v353_v18 = vmul.f32 0.6931472, %v1004_v31 }
  0x30   : > { %v1008_v36 = vpop.eup %1007  ;;  %1033 = vlog2.f32 %v321_v26  ;;  %v355_v20 = vmul.f32 0.6931472, %v1006_v34 }
  0x31   : > { %v1010_v39 = vpop.eup %1009  ;;  %1035 = vlog2.f32 %v326_v29  ;;  %v349_v29 = vmul.f32 0.6931472, %v1008_v36 }
  0x32   : > { %v1012_v44 = vpop.eup %1011  ;;  %1037 = vlog2.f32 %v327_v32  ;;  %v351_v30 = vmul.f32 0.6931472, %v1010_v39 }
  0x33   : > { %v1014_v48 = vpop.eup %1013  ;;  %1039 = vlog2.f32 %v324_v35 }
  0x34   : > { %v1016_v50 = vpop.eup %1015  ;;  %1041 = vlog2.f32 %v325_v37  ;;  %v361_v37 = vmul.f32 0.6931472, %v1012_v44  ;;  %v363_v38 = vmul.f32 0.6931472, %v1014_v48 }
  0x35   : > { %v1018_v53 = vpop.eup %1017  ;;  %1043 = vlog2.f32 %v330_v41 }
  0x36   : > { %v1020_v60 = vpop.eup %1019  ;;  %1045 = vlog2.f32 %v331_v49  ;;  %v359_v49 = vmul.f32 0.6931472, %v1018_v53 }
  0x37   : > { %v1022_v0 = vpop.eup %1021  ;;  %1047 = vlog2.f32 %v328_v51  ;;  %v369_v48 = vmul.f32 0.6931472, %v1020_v60 }
  0x38   : > { %v1024_v21 = vpop.eup %1023  ;;  %1049 = vlog2.f32 %v329_v52 }
  0x39   : > { %v1026_v27 = vpop.eup %1025 }
  0x3a   : > { %v1028_v32 = vpop.eup %1027 }
  0x3b   : > { %v1030_v31 = vpop.eup %1029 }
  0x8d   : > { %v409_v54 = vpop.permute.xlu1 %408  ;;  %v399_v56 = vpop.permute.xlu0 %398 }
  0x8e   : > { %v480_v62 = vmul.f32 %v409_v54, %v341_v40  ;;  %v481_v58 = vmul.f32 %v409_v54, %v343_v45  ;;  %v476_v61 = vmul.f32 %v399_v56, %v333_v46  ;;  %v477_v63 = vmul.f32 %v399_v56, %v335_v47  ;;  %v1032_v40 = vpop.eup %1031 }
  0x8f   : > { %v1034_v45 = vpop.eup %1033  ;;  %v357_v47 = vmul.f32 0.6931472, %v1016_v50 }
  0x90   : > { %v516_v23 = vmul.f32 1.442695, %v480_v62  ;;  %v518_v24 = vmul.f32 1.442695, %v481_v58  ;;  %v508_v26 = vmul.f32 1.442695, %v476_v61  ;;  %v1036_v51 = vpop.eup %1035 }
  0x91   : > { %v510_v19 = vmul.f32 1.442695, %v477_v63  ;;  %v414_v22 = vpop.permute.xlu1 %413  ;;  %v404_v25 = vpop.permute.xlu0 %403 }
  0x92   : > { %1051 = vpow2.f32 %v516_v23  ;;  %v482_v33 = vmul.f32 %v414_v22, %v345_v55  ;;  %v483_v35 = vmul.f32 %v414_v22, %v347_v57  ;;  %v478_v28 = vmul.f32 %v404_v25, %v337_v59  ;;  %v1038_v55 = vpop.eup %1037 }
  0x93   : > { %1053 = vpow2.f32 %v518_v24  ;;  %v479_v34 = vmul.f32 %v404_v25, %v339_v17  ;;  %v371_v57 = vmul.f32 0.6931472, %v1022_v0  ;;  %v1040_v59 = vpop.eup %1039  ;;  %v365_v23 = vmul.f32 0.6931472, %v1024_v21 }
  0x94   : > { %1055 = vpow2.f32 %v508_v26  ;;  %v520_v41 = vmul.f32 1.442695, %v482_v33  ;;  %v522_v42 = vmul.f32 1.442695, %v483_v35  ;;  %v512_v43 = vmul.f32 1.442695, %v478_v28  ;;  %v1042_v63 = vpop.eup %1041 }
  0x95   : > { %1057 = vpow2.f32 %v510_v19  ;;  %v514_v36 = vmul.f32 1.442695, %v479_v34  ;;  %v424_v39 = vpop.permute.xlu1 %423  ;;  %v419_v46 = vpop.permute.xlu0 %418  ;;  %v367_v24 = vmul.f32 0.6931472, %v1026_v27  ;;  %v377_v0 = vmul.f32 0.6931472, %v1028_v32 }
  0x96   : > { %1059 = vpow2.f32 %v520_v41  ;;  %v486_v52 = vmul.f32 %v424_v39, %v353_v18  ;;  %v487_v54 = vmul.f32 %v424_v39, %v355_v20  ;;  %v484_v56 = vmul.f32 %v419_v46, %v349_v29  ;;  %v1044_v18 = vpop.eup %1043 }
  0x97   : > { %1061 = vpow2.f32 %v522_v42  ;;  %v485_v44 = vmul.f32 %v419_v46, %v351_v30  ;;  %v379_v22 = vmul.f32 0.6931472, %v1030_v31  ;;  %v1046_v25 = vpop.eup %1045  ;;  %v373_v27 = vmul.f32 0.6931472, %v1032_v40 }
  0x98   : > { %1063 = vpow2.f32 %v512_v43  ;;  %v528_v62 = vmul.f32 1.442695, %v486_v52  ;;  %v530_v58 = vmul.f32 1.442695, %v487_v54  ;;  %v524_v61 = vmul.f32 1.442695, %v484_v56  ;;  %v1048_v35 = vpop.eup %1047 }
  0x99   : > { %1065 = vpow2.f32 %v514_v36  ;;  %v526_v17 = vmul.f32 1.442695, %v485_v44  ;;  %v434_v50 = vpop.permute.xlu1 %433  ;;  %v429_v53 = vpop.permute.xlu0 %428  ;;  %v375_v41 = vmul.f32 0.6931472, %v1034_v45  ;;  %v385_v31 = vmul.f32 0.6931472, %v1036_v51 }
  0x9a   : > { %1067 = vpow2.f32 %v528_v62  ;;  %v490_v20 = vmul.f32 %v434_v50, %v361_v37  ;;  %v491_v26 = vmul.f32 %v434_v50, %v363_v38  ;;  %v488_v19 = vmul.f32 %v429_v53, %v357_v47  ;;  %v1050_v42 = vpop.eup %1049 }
  0x9b   : > { %1069 = vpow2.f32 %v530_v58  ;;  %v489_v60 = vmul.f32 %v429_v53, %v359_v49  ;;  %v387_v39 = vmul.f32 0.6931472, %v1038_v55  ;;  %v381_v52 = vmul.f32 0.6931472, %v1040_v59 }
  0x9c   : > { %1071 = vpow2.f32 %v524_v61  ;;  %v536_v29 = vmul.f32 1.442695, %v490_v20  ;;  %v538_v30 = vmul.f32 1.442695, %v491_v26  ;;  %v532_v33 = vmul.f32 1.442695, %v488_v19 }
  0x9d   : > { %1073 = vpow2.f32 %v526_v17  ;;  %v534_v28 = vmul.f32 1.442695, %v489_v60  ;;  %v444_v34 = vpop.permute.xlu1 %443  ;;  %v439_v21 = vpop.permute.xlu0 %438  ;;  %v383_v44 = vmul.f32 0.6931472, %v1042_v63  ;;  %v393_v62 = vmul.f32 0.6931472, %v1044_v18 }
  0x9e   : > { %1075 = vpow2.f32 %v536_v29  ;;  %v494_v37 = vmul.f32 %v444_v34, %v369_v48  ;;  %v495_v38 = vmul.f32 %v444_v34, %v371_v57  ;;  %v492_v43 = vmul.f32 %v439_v21, %v365_v23 }
  0x9f   : > { %v1052_v36 = vpop.eup %1051  ;;  %1077 = vpow2.f32 %v538_v30  ;;  %v493_v32 = vmul.f32 %v439_v21, %v367_v24  ;;  %v395_v53 = vmul.f32 0.6931472, %v1046_v25  ;;  %v389_v20 = vmul.f32 0.6931472, %v1048_v35 }
  0xa0   : > { %v1054_v46 = vpop.eup %1053  ;;  %1079 = vpow2.f32 %v532_v33  ;;  %v544_v47 = vmul.f32 1.442695, %v494_v37  ;;  %v540_v49 = vmul.f32 1.442695, %v492_v43  ;;  %v546_v57 = vmul.f32 1.442695, %v495_v38 }
  0xa1   : > { %v1056_v54 = vpop.eup %1055  ;;  %1081 = vpow2.f32 %v534_v28  ;;  %v542_v56 = vmul.f32 1.442695, %v493_v32  ;;  %v454_v40 = vpop.permute.xlu1 %453  ;;  %v594_v60 = vadd.f32 %v1054_v46, %v1052_v36 }
  0xa2   : > { %v449_v45 = vpop.permute.xlu0 %448  ;;  %v1058_v48 = vpop.eup %1057  ;;  %v498_v58 = vmul.f32 %v454_v40, %v377_v0  ;;  %v499_v61 = vmul.f32 %v454_v40, %v379_v22  ;;  %1083 = vpow2.f32 %v544_v47  ;;  %v391_v0 = vmul.f32 0.6931472, %v1050_v42 }
  0xa3   : > { %v496_v17 = vmul.f32 %v449_v45, %v373_v27  ;;  %v1060_v50 = vpop.eup %1059  ;;  %v497_v51 = vmul.f32 %v449_v45, %v375_v41  ;;  %v588_v55 = vadd.f32 %v1058_v48, %v1056_v54  ;;  %1085 = vpow2.f32 %v540_v49 }
  0xa4   : > { %v1062_v23 = vpop.eup %1061  ;;  %v552_v59 = vmul.f32 1.442695, %v498_v58  ;;  %1087 = vpow2.f32 %v542_v56  ;;  %v554_v29 = vmul.f32 1.442695, %v499_v61 }
  0xa5   : > { %v548_v24 = vmul.f32 1.442695, %v496_v17  ;;  %v1064_v26 = vpop.eup %1063  ;;  %v550_v19 = vmul.f32 1.442695, %v497_v51  ;;  %589 = vadd.xlane.f32.xlu0 %v588_v55  ;;  %v464_v63 = vpop.permute.xlu1 %463  ;;  %1089 = vpow2.f32 %v546_v57  ;;  %v597_v43 = vadd.f32 %v1062_v23, %v1060_v50 }
  0xa6   : > { %v459_v18 = vpop.permute.xlu0 %458  ;;  %v1066_v22 = vpop.eup %1065  ;;  %v502_v30 = vmul.f32 %v464_v63, %v385_v31  ;;  %1091 = vpow2.f32 %v552_v59  ;;  %v503_v25 = vmul.f32 %v464_v63, %v387_v39 }
  0xa7   : > { %v500_v33 = vmul.f32 %v459_v18, %v381_v52  ;;  %v1068_v28 = vpop.eup %1067  ;;  %v501_v34 = vmul.f32 %v459_v18, %v383_v44  ;;  %v591_v21 = vadd.f32 %v1066_v22, %v1064_v26  ;;  %1093 = vpow2.f32 %v548_v24 }
  0xa8   : > { %v1070_v27 = vpop.eup %1069  ;;  %1095 = vpow2.f32 %v550_v19  ;;  %v560_v32 = vmul.f32 1.442695, %v502_v30  ;;  %v562_v39 = vmul.f32 1.442695, %v503_v25 }
  0xa9   : > { %v556_v35 = vmul.f32 1.442695, %v500_v33  ;;  %v1072_v41 = vpop.eup %1071  ;;  %v558_v37 = vmul.f32 1.442695, %v501_v34  ;;  %592 = vadd.xlane.f32.xlu1 %v591_v21  ;;  %595 = vadd.xlane.f32.xlu0 %v594_v60  ;;  %v474_v38 = vpop.permute.xlu1 %473  ;;  %1097 = vpow2.f32 %v554_v29  ;;  %v603_v61 = vadd.f32 %v1070_v27, %v1068_v28 }
  0xaa   : > { %v469_v42 = vpop.permute.xlu0 %468  ;;  %v1074_v36 = vpop.eup %1073  ;;  %v506_v31 = vmul.f32 %v474_v38, %v393_v62  ;;  %v507_v49 = vmul.f32 %v474_v38, %v395_v53 }
  0xab   : > { %v504_v46 = vmul.f32 %v469_v42, %v389_v20  ;;  %v1076_v47 = vpop.eup %1075  ;;  %v505_v52 = vmul.f32 %v469_v42, %v391_v0  ;;  %v600_v54 = vadd.f32 %v1074_v36, %v1072_v41  ;;  %1099 = vpow2.f32 %v556_v35  ;;  %v572_v41 = vld [vmem:[#allocation2] sm:$0xff]  ;;  %v573_v42 = vld [vmem:[#allocation2 + $0x8] sm:$0xff] }
  0xac   : > { %v1078_v56 = vpop.eup %1077  ;;  %1101 = vpow2.f32 %v558_v37  ;;  %v568_v57 = vmul.f32 1.442695, %v506_v31  ;;  %v570_v58 = vmul.f32 1.442695, %v507_v49 }
  0xad   : > { %v564_v40 = vmul.f32 1.442695, %v504_v46  ;;  %v1080_v45 = vpop.eup %1079  ;;  %v566_v44 = vmul.f32 1.442695, %v505_v52  ;;  %601 = vadd.xlane.f32.xlu1 %v600_v54  ;;  %598 = vadd.xlane.f32.xlu0 %v597_v43  ;;  %1103 = vpow2.f32 %v560_v32  ;;  %v609_v23 = vadd.f32 %v1078_v56, %v1076_v47  ;;  %v574_v43 = vld [vmem:[#allocation2 + $0x10] sm:$0xff]  ;;  %v576_v47 = vld [vmem:[#allocation2 + $0x20] sm:$0xff] }
  0xae   : > { %v1082_v48 = vpop.eup %1081  ;;  %1105 = vpow2.f32 %v562_v39  ;;  %v575_v39 = vld [vmem:[#allocation2 + $0x18] sm:$0xff] }
  0xaf   : > { %v606_v62 = vadd.f32 %v1082_v48, %v1080_v45  ;;  %v1084_v17 = vpop.eup %1083  ;;  %1107 = vpow2.f32 %v564_v40  ;;  %v578_v45 = vld [vmem:[#allocation2 + $0x30] sm:$0xff] }
  0xb0   : > { %v1086_v50 = vpop.eup %1085  ;;  %1109 = vpow2.f32 %v566_v44  ;;  %v577_v44 = vld [vmem:[#allocation2 + $0x28] sm:$0xff] }
  0xb1   : > { %607 = vadd.xlane.f32.xlu1 %v606_v62  ;;  %604 = vadd.xlane.f32.xlu0 %v603_v61  ;;  %v1088_v51 = vpop.eup %1087  ;;  %1111 = vpow2.f32 %v568_v57  ;;  %v580_v62 = vld [vmem:[#allocation2 + $0x40] sm:$0xff] }
  0xb2   : > { %v1090_v55 = vpop.eup %1089  ;;  %1113 = vpow2.f32 %v570_v58  ;;  %v612_v53 = vadd.f32 %v1088_v51, %v1086_v50 }
  0xb3   : > { %v1092_v59 = vpop.eup %1091  ;;  %v615_v63 = vadd.f32 %v1090_v55, %v1084_v17  ;;  %1115 = vrcp.f32 %v1310_v1  ;;  %v579_v17 = vld [vmem:[#allocation2 + $0x38] sm:$0xff] }
  0xb4   : > { %v1094_v24 = vpop.eup %1093  ;;  %1117 = vrcp.f32 %v1312_v2 }
  0xb5   : > { %613 = vadd.xlane.f32.xlu1 %v612_v53  ;;  %610 = vadd.xlane.f32.xlu0 %v609_v23  ;;  %v1096_v20 = vpop.eup %1095  ;;  %1119 = vrcp.f32 %v1316_v3  ;;  %v582_v23 = vld [vmem:[#allocation2 + $0x50] sm:$0xff] }
  0xb6   : > { %v1098_v26 = vpop.eup %1097  ;;  %v618_v19 = vadd.f32 %v1096_v20, %v1094_v24  ;;  %1121 = vrcp.f32 %v1318_v4  ;;  %v581_v24 = vld [vmem:[#allocation2 + $0x48] sm:$0xff] }
  0xb7   : > { %v621_v29 = vadd.f32 %v1098_v26, %v1092_v59  ;;  %1123 = vrcp.f32 %v1322_v5 }
  0xb8   : > { %v1100_v18 = vpop.eup %1099 }
  0xb9   : > { %619 = vadd.xlane.f32.xlu1 %v618_v19  ;;  %616 = vadd.xlane.f32.xlu0 %v615_v63  ;;  %v1102_v60 = vpop.eup %1101 }
  0xba   : > { %v1104_v0 = vpop.eup %1103  ;;  %v624_v22 = vadd.f32 %v1102_v60, %v1100_v18  ;;  %v584_v60 = vld [vmem:[#allocation2 + $0x60] sm:$0xff] }
  0xbb   : > { %v1106_v30 = vpop.eup %1105 }
  0xbc   : > { %v1108_v33 = vpop.eup %1107  ;;  %v627_v21 = vadd.f32 %v1106_v30, %v1104_v0 }
  0xbd   : > { %625 = vadd.xlane.f32.xlu1 %v624_v22  ;;  %622 = vadd.xlane.f32.xlu0 %v621_v29  ;;  %v1110_v28 = vpop.eup %1109  ;;  %v583_v29 = vld [vmem:[#allocation2 + $0x58] sm:$0xff] }
  0xbe   : > { %v1112_v25 = vpop.eup %1111  ;;  %v630_v34 = vadd.f32 %v1110_v28, %v1108_v33 }
  0xbf   : > { %v1114_v27 = vpop.eup %1113 }
  0xc0   : > { %v633_v35 = vadd.f32 %v1114_v27, %v1112_v25  ;;  %v1432_v19 = vpop.eup %1115 }
  0xc1   : > { %631 = vadd.xlane.f32.xlu1 %v630_v34  ;;  %628 = vadd.xlane.f32.xlu0 %v627_v21  ;;  %v1118_v0 = vpop.eup %1117 }
  0xc2   : > { %v1434_v30 = vpop.eup %1119 }
  0xc5   : > { %634 = vadd.xlane.f32.xlu0 %v633_v35 }
 0x12e   : > { %v590_v37 = vpop.xlane.xlu0 %589 }
 0x12f   : > { %v636_v38 = vadd.f32 %v590_v37, %v572_v41  ;;  %v586_v41 = vld [vmem:[#allocation2 + $0x70] sm:$0xff] }
 0x131   : > { %653 = vst.msk [vmem:[#allocation2] sm:$0xff] %vm235_vm0, %v636_v38 }
 0x132   : > { %v593_v36 = vpop.xlane.xlu1 %592  ;;  %v596_v32 = vpop.xlane.xlu0 %595 }
 0x133   : > { %v637_v31 = vadd.f32 %v593_v36, %v573_v42  ;;  %v638_v46 = vadd.f32 %v596_v32, %v574_v43  ;;  %v585_v42 = vld [vmem:[#allocation2 + $0x68] sm:$0xff] }
 0x135   : > { %654 = vst.msk [vmem:[#allocation2 + $0x8] sm:$0xff] %vm235_vm0, %v637_v31  ;;  %655 = vst.msk [vmem:[#allocation2 + $0x10] sm:$0xff] %vm235_vm0, %v638_v46 }
 0x136   : > { %v602_v49 = vpop.xlane.xlu1 %601  ;;  %v599_v52 = vpop.xlane.xlu0 %598 }
 0x137   : > { %v640_v54 = vadd.f32 %v602_v49, %v576_v47  ;;  %v639_v56 = vadd.f32 %v599_v52, %v575_v39 }
 0x138   : > { %v672_v40 = vld [vmem:[#allocation2] sm:$0xff] }
 0x139   : > { %v688_v48 = vmul.f32 0.00390625, %v672_v40  ;;  %657 = vst.msk [vmem:[#allocation2 + $0x20] sm:$0xff] %vm235_vm0, %v640_v54  ;;  %656 = vst.msk [vmem:[#allocation2 + $0x18] sm:$0xff] %vm235_vm0, %v639_v56 }
 0x13a   : > { %v608_v1 = vpop.xlane.xlu1 %607  ;;  %v605_v57 = vpop.xlane.xlu0 %604 }
 0x13b   : > { %1125 = vlog2.f32 %v688_v48  ;;  %v642_v2 = vadd.f32 %v608_v1, %v578_v45  ;;  %v641_v58 = vadd.f32 %v605_v57, %v577_v44  ;;  %v587_v45 = vld [vmem:[#allocation2 + $0x78] sm:$0xff] }
 0x13c   : > { %1127 = vrcp.f32 %v1324_v6  ;;  %v673_v3 = vld [vmem:[#allocation2 + $0x8] sm:$0xff]  ;;  %v674_v61 = vld [vmem:[#allocation2 + $0x10] sm:$0xff] }
 0x13d   : > { %1129 = vrcp.f32 %v1328_v7  ;;  %v689_v4 = vmul.f32 0.00390625, %v673_v3  ;;  %v690_v50 = vmul.f32 0.00390625, %v674_v61  ;;  %659 = vst.msk [vmem:[#allocation2 + $0x30] sm:$0xff] %vm235_vm0, %v642_v2  ;;  %658 = vst.msk [vmem:[#allocation2 + $0x28] sm:$0xff] %vm235_vm0, %v641_v58 }
 0x13e   : > { %1131 = vrcp.f32 %v1330_v8  ;;  %v614_v5 = vpop.xlane.xlu1 %613  ;;  %v611_v51 = vpop.xlane.xlu0 %610 }
 0x13f   : > { %1133 = vlog2.f32 %v689_v4  ;;  %v644_v55 = vadd.f32 %v614_v5, %v580_v62  ;;  %v643_v53 = vadd.f32 %v611_v51, %v579_v17 }
 0x140   : > { %1135 = vlog2.f32 %v690_v50  ;;  %v676_v6 = vld [vmem:[#allocation2 + $0x20] sm:$0xff]  ;;  %v675_v59 = vld [vmem:[#allocation2 + $0x18] sm:$0xff] }
 0x141   : > { %1137 = vrcp.f32 %v1334_v9  ;;  %v692_v7 = vmul.f32 0.00390625, %v676_v6  ;;  %v691_v20 = vmul.f32 0.00390625, %v675_v59  ;;  %661 = vst.msk [vmem:[#allocation2 + $0x40] sm:$0xff] %vm235_vm0, %v644_v55  ;;  %660 = vst.msk [vmem:[#allocation2 + $0x38] sm:$0xff] %vm235_vm0, %v643_v53 }
 0x142   : > { %1139 = vrcp.f32 %v1336_v10  ;;  %v620_v8 = vpop.xlane.xlu1 %619  ;;  %v617_v26 = vpop.xlane.xlu0 %616 }
 0x143   : > { %1141 = vlog2.f32 %v692_v7  ;;  %v646_v63 = vadd.f32 %v620_v8, %v582_v23  ;;  %v645_v18 = vadd.f32 %v617_v26, %v581_v24  ;;  %v1122_v10 = vpop.eup %1121 }
 0x144   : > { %1143 = vlog2.f32 %v691_v20  ;;  %v678_v22 = vld [vmem:[#allocation2 + $0x30] sm:$0xff]  ;;  %v677_v9 = vld [vmem:[#allocation2 + $0x28] sm:$0xff]  ;;  %v1440_v21 = vpop.eup %1123 }
 0x145   : > { %1145 = vrcp.f32 %v1340_v11  ;;  %v694_v33 = vmul.f32 0.00390625, %v678_v22  ;;  %v693_v28 = vmul.f32 0.00390625, %v677_v9  ;;  %663 = vst.msk [vmem:[#allocation2 + $0x50] sm:$0xff] %vm235_vm0, %v646_v63  ;;  %662 = vst.msk [vmem:[#allocation2 + $0x48] sm:$0xff] %vm235_vm0, %v645_v18 }
 0x146   : > { %1147 = vrcp.f32 %v1342_v12  ;;  %v626_v25 = vpop.xlane.xlu1 %625  ;;  %v623_v34 = vpop.xlane.xlu0 %622 }
 0x147   : > { %1149 = vlog2.f32 %v694_v33  ;;  %v648_v27 = vadd.f32 %v626_v25, %v584_v60  ;;  %v647_v35 = vadd.f32 %v623_v34, %v583_v29 }
 0x148   : > { %v1126_v37 = vpop.eup %1125  ;;  %1151 = vlog2.f32 %v693_v28  ;;  %v680_v11 = vld [vmem:[#allocation2 + $0x40] sm:$0xff]  ;;  %v679_v38 = vld [vmem:[#allocation2 + $0x38] sm:$0xff] }
 0x149   : > { %v1128_v43 = vpop.eup %1127  ;;  %1153 = vrcp.f32 %v1346_v13  ;;  %v705_v36 = vmul.f32 0.6931472, %v1126_v37  ;;  %v696_v32 = vmul.f32 0.00390625, %v680_v11  ;;  %v695_v31 = vmul.f32 0.00390625, %v679_v38  ;;  %665 = vst.msk [vmem:[#allocation2 + $0x60] sm:$0xff] %vm235_vm0, %v648_v27  ;;  %664 = vst.msk [vmem:[#allocation2 + $0x58] sm:$0xff] %vm235_vm0, %v647_v35 }
 0x14a   : > { %v1445_v12 = vpop.eup %1129  ;;  %1155 = vrcp.f32 %v1348_v14  ;;  %v632_v46 = vpop.xlane.xlu1 %631 }
 0x14b   : > { %v629_v47 = vpop.xlane.xlu0 %628  ;;  %v1132_v39 = vpop.eup %1131  ;;  %v737_v49 = vmul.f32 %v1118_v0, %v705_v36  ;;  %1157 = vlog2.f32 %v696_v32  ;;  %v650_v52 = vadd.f32 %v632_v46, %v586_v41 }
 0x14c   : > { %v649_v54 = vadd.f32 %v629_v47, %v585_v42  ;;  %v1134_v56 = vpop.eup %1133  ;;  %1159 = vlog2.f32 %v695_v31  ;;  %v682_v13 = vld [vmem:[#allocation2 + $0x50] sm:$0xff]  ;;  %v681_v40 = vld [vmem:[#allocation2 + $0x48] sm:$0xff] }
 0x14d   : > { %v1136_v44 = vpop.eup %1135  ;;  %v768_v48 = vmul.f32 1.442695, %v737_v49  ;;  %v707_v1 = vmul.f32 0.6931472, %v1134_v56  ;;  %v698_v57 = vmul.f32 0.00390625, %v682_v13  ;;  %v697_v2 = vmul.f32 0.00390625, %v681_v40 }
 0x14e   : > { %667 = vst.msk [vmem:[#allocation2 + $0x70] sm:$0xff] %vm235_vm0, %v650_v52  ;;  %666 = vst.msk [vmem:[#allocation2 + $0x68] sm:$0xff] %vm235_vm0, %v649_v54  ;;  %v1450_v14 = vpop.eup %1137  ;;  %1161 = vrcp.f32 %v1352_v15  ;;  %v709_v58 = vmul.f32 0.6931472, %v1136_v44 }
 0x14f   : > { %v635_v62 = vpop.xlane.xlu0 %634  ;;  %v1140_v3 = vpop.eup %1139  ;;  %1163 = vpow2.f32 %v768_v48  ;;  %v739_v61 = vmul.f32 %v1122_v10, %v707_v1 }
 0x150   : > { %v651_v17 = vadd.f32 %v635_v62, %v587_v45  ;;  %v1142_v4 = vpop.eup %1141  ;;  %v741_v50 = vmul.f32 %v1432_v19, %v709_v58  ;;  %1165 = vlog2.f32 %v698_v57  ;;  %v684_v5 = vld [vmem:[#allocation2 + $0x60] sm:$0xff]  ;;  %v683_v51 = vld [vmem:[#allocation2 + $0x58] sm:$0xff] }
 0x151   : > { %v1144_v55 = vpop.eup %1143  ;;  %v770_v53 = vmul.f32 1.442695, %v739_v61  ;;  %v713_v23 = vmul.f32 0.6931472, %v1142_v4  ;;  %1167 = vlog2.f32 %v697_v2  ;;  %v700_v6 = vmul.f32 0.00390625, %v684_v5 }
 0x152   : > { %668 = vst.msk [vmem:[#allocation2 + $0x78] sm:$0xff] %vm235_vm0, %v651_v17  ;;  %v1455_v15 = vpop.eup %1145  ;;  %1169 = vrcp.f32 %v1354_v16  ;;  %v772_v59 = vmul.f32 1.442695, %v741_v50  ;;  %v711_v24 = vmul.f32 0.6931472, %v1144_v55  ;;  %v699_v7 = vmul.f32 0.00390625, %v683_v51 }
 0x153   : > { %v1148_v20 = vpop.eup %1147  ;;  %1171 = vpow2.f32 %v770_v53  ;;  %v745_v8 = vmul.f32 %v1128_v43, %v713_v23 }
 0x154   : > { %v1150_v26 = vpop.eup %1149  ;;  %1173 = vpow2.f32 %v772_v59  ;;  %v743_v19 = vmul.f32 %v1434_v30, %v711_v24 }
 0x155   : > { %v686_v63 = vld [vmem:[#allocation2 + $0x70] sm:$0xff]  ;;  %v685_v18 = vld [vmem:[#allocation2 + $0x68] sm:$0xff]  ;;  %v1152_v60 = vpop.eup %1151  ;;  %v776_v0 = vmul.f32 1.442695, %v745_v8  ;;  %v717_v22 = vmul.f32 0.6931472, %v1150_v26  ;;  %1175 = vlog2.f32 %v700_v6 }
 0x156   : > { %v702_v9 = vmul.f32 0.00390625, %v686_v63  ;;  %v1459_v29 = vpop.eup %1153  ;;  %v774_v16 = vmul.f32 1.442695, %v743_v19  ;;  %v715_v33 = vmul.f32 0.6931472, %v1152_v60  ;;  %1177 = vlog2.f32 %v699_v7 }
 0x157   : > { %v701_v28 = vmul.f32 0.00390625, %v685_v18  ;;  %v1156_v10 = vpop.eup %1155  ;;  %1179 = vpow2.f32 %v776_v0  ;;  %v749_v25 = vmul.f32 %v1132_v39, %v717_v22 }
 0x158   : > { %v1158_v34 = vpop.eup %1157  ;;  %1181 = vpow2.f32 %v774_v16  ;;  %v747_v30 = vmul.f32 %v1440_v21, %v715_v33 }
 0x159   : > { %v687_v27 = vld [vmem:[#allocation2 + $0x78] sm:$0xff]  ;;  %v1160_v35 = vpop.eup %1159  ;;  %v780_v41 = vmul.f32 1.442695, %v749_v25  ;;  %v721_v37 = vmul.f32 0.6931472, %v1158_v34  ;;  %1183 = vlog2.f32 %v702_v9 }
 0x15a   : > { %v703_v11 = vmul.f32 0.00390625, %v687_v27  ;;  %v778_v38 = vmul.f32 1.442695, %v747_v30  ;;  %v719_v42 = vmul.f32 0.6931472, %v1160_v35  ;;  %1185 = vlog2.f32 %v701_v28 }
 0x15b   : > { %v1162_v43 = vpop.eup %1161  ;;  %1187 = vpow2.f32 %v780_v41  ;;  %v753_v36 = vmul.f32 %v1140_v3, %v721_v37 }
 0x15c   : > { %v1164_v32 = vpop.eup %1163  ;;  %1189 = vpow2.f32 %v778_v38  ;;  %v751_v21 = vmul.f32 %v1445_v12, %v719_v42 }
 0x15d   : > { %v1166_v31 = vpop.eup %1165  ;;  %800 = vst.msk [vmem:[%s1466_s5] sm:$0xff] %vm235_vm0, %v1164_v32  ;;  %v784_v46 = vmul.f32 1.442695, %v753_v36  ;;  %1191 = vlog2.f32 %v703_v11 }
 0x15e   : > { %v1168_v47 = vpop.eup %1167  ;;  %v782_v39 = vmul.f32 1.442695, %v751_v21  ;;  %v725_v49 = vmul.f32 0.6931472, %v1166_v31 }
 0x15f   : > { %v1170_v52 = vpop.eup %1169  ;;  %1193 = vpow2.f32 %v784_v46  ;;  %v723_v54 = vmul.f32 0.6931472, %v1168_v47 }
 0x160   : > { %v1172_v56 = vpop.eup %1171  ;;  %1195 = vpow2.f32 %v782_v39  ;;  %v757_v13 = vmul.f32 %v1148_v20, %v725_v49 }
 0x161   : > { %v1174_v40 = vpop.eup %1173  ;;  %801 = vst.msk [vmem:[%s1466_s5 + $0x8] sm:$0xff] %vm235_vm0, %v1172_v56  ;;  %v755_v12 = vmul.f32 %v1450_v14, %v723_v54 }
 0x162   : > { %v1176_v45 = vpop.eup %1175  ;;  %802 = vst.msk [vmem:[%s1466_s5 + $0x10] sm:$0xff] %vm235_vm0, %v1174_v40  ;;  %v788_v44 = vmul.f32 1.442695, %v757_v13 }
 0x163   : > { %v1178_v48 = vpop.eup %1177  ;;  %v786_v1 = vmul.f32 1.442695, %v755_v12  ;;  %v729_v57 = vmul.f32 0.6931472, %v1176_v45 }
 0x164   : > { %v1180_v2 = vpop.eup %1179  ;;  %1197 = vpow2.f32 %v788_v44  ;;  %v727_v58 = vmul.f32 0.6931472, %v1178_v48 }
 0x165   : > { %v1182_v62 = vpop.eup %1181  ;;  %804 = vst.msk [vmem:[%s1466_s5 + $0x20] sm:$0xff] %vm235_vm0, %v1180_v2  ;;  %1199 = vpow2.f32 %v786_v1  ;;  %v761_v3 = vmul.f32 %v1156_v10, %v729_v57 }
 0x166   : > { %v1184_v61 = vpop.eup %1183  ;;  %803 = vst.msk [vmem:[%s1466_s5 + $0x18] sm:$0xff] %vm235_vm0, %v1182_v62  ;;  %v759_v14 = vmul.f32 %v1455_v15, %v727_v58 }
 0x167   : > { %v1186_v17 = vpop.eup %1185  ;;  %v792_v4 = vmul.f32 1.442695, %v761_v3  ;;  %v733_v50 = vmul.f32 0.6931472, %v1184_v61 }
 0x168   : > { %v1188_v5 = vpop.eup %1187  ;;  %v790_v51 = vmul.f32 1.442695, %v759_v14  ;;  %v731_v55 = vmul.f32 0.6931472, %v1186_v17 }
 0x169   : > { %v1190_v53 = vpop.eup %1189  ;;  %806 = vst.msk [vmem:[%s1466_s5 + $0x30] sm:$0xff] %vm235_vm0, %v1188_v5  ;;  %1201 = vpow2.f32 %v792_v4  ;;  %v765_v23 = vmul.f32 %v1170_v52, %v733_v50 }
 0x16a   : > { %v1192_v6 = vpop.eup %1191  ;;  %805 = vst.msk [vmem:[%s1466_s5 + $0x28] sm:$0xff] %vm235_vm0, %v1190_v53  ;;  %1203 = vpow2.f32 %v790_v51  ;;  %v763_v15 = vmul.f32 %v1459_v29, %v731_v55 }
 0x16b   : > { %v796_v59 = vmul.f32 1.442695, %v765_v23  ;;  %v735_v24 = vmul.f32 0.6931472, %v1192_v6 }
 0x16c   : > { %v1194_v7 = vpop.eup %1193  ;;  %v794_v20 = vmul.f32 1.442695, %v763_v15 }
 0x16d   : > { %v1196_v8 = vpop.eup %1195  ;;  %808 = vst.msk [vmem:[%s1466_s5 + $0x40] sm:$0xff] %vm235_vm0, %v1194_v7  ;;  %1205 = vpow2.f32 %v796_v59  ;;  %v767_v26 = vmul.f32 %v1162_v43, %v735_v24 }
 0x16e   : > { %807 = vst.msk [vmem:[%s1466_s5 + $0x38] sm:$0xff] %vm235_vm0, %v1196_v8  ;;  %1207 = vpow2.f32 %v794_v20 }
 0x16f   : > { %v798_v19 = vmul.f32 1.442695, %v767_v26 }
 0x171   : > { %v1198_v63 = vpop.eup %1197  ;;  %1209 = vpow2.f32 %v798_v19 }
 0x172   : > { %v1200_v18 = vpop.eup %1199  ;;  %810 = vst.msk [vmem:[%s1466_s5 + $0x50] sm:$0xff] %vm235_vm0, %v1198_v63 }
 0x173   : > { %809 = vst.msk [vmem:[%s1466_s5 + $0x48] sm:$0xff] %vm235_vm0, %v1200_v18 }
 0x176   : > { %v1202_v60 = vpop.eup %1201 }
 0x177   : > { %v1204_v0 = vpop.eup %1203  ;;  %812 = vst.msk [vmem:[%s1466_s5 + $0x60] sm:$0xff] %vm235_vm0, %v1202_v60 }
 0x178   : > { %811 = vst.msk [vmem:[%s1466_s5 + $0x58] sm:$0xff] %vm235_vm0, %v1204_v0 }
 0x17a   : > { %v1206_v22 = vpop.eup %1205 }
 0x17b   : > { %v1208_v9 = vpop.eup %1207  ;;  %814 = vst.msk [vmem:[%s1466_s5 + $0x70] sm:$0xff] %vm235_vm0, %v1206_v22 }
 0x17c   : > { %813 = vst.msk [vmem:[%s1466_s5 + $0x68] sm:$0xff] %vm235_vm0, %v1208_v9 }
 0x17e   : > { %v1210_v29 = vpop.eup %1209 }
 0x17f   : > { %815 = vst.msk [vmem:[%s1466_s5 + $0x78] sm:$0xff] %vm235_vm0, %v1210_v29 }
 0x180 PF: > { %s12_s13 = sadd.s32 1, %s1249_s13   ;;  %s1522_s9 = smov %s1241_s11 }
 0x181   : > { %p9_p7 = scmp.ge.s32.totalorder %s12_s13, 6   ;;  %s1523_s10 = smov %s1245_s12 }
 0x182   : > { %s1524_s11 = smov %s1527_s14  ;;  %s1525_s12 = smov %s1531_s15 }
 0x183   :  { %11 = sbr.rel (!%p9_p7) target bundleno = 3 (0x3), region = 69 }

</bundles_post_ra>
